<compile_context>
chip_gen: v7x
topology: tpu7x:2x2x1
jax: 0.10.0
libtpu: 0.0.40
codegen_flags: <defaults>
</compile_context>

<pallas_src>
import math
import jax
import jax.numpy as jnp
from jax.experimental import pallas as pl
from jax.experimental.pallas import tpu as pltpu


# --------------------------- fused model kernel -----------------------------
def make_fused_kernel(T, H):
    def kernel(x_ref, wih_ref, whh_ref, wh_ref, bh_ref, out_ref, hs_ref):
        # Input projection (gate bias already folded via the ones column) for
        # ALL timesteps in one matmul at kernel start.
        xproj = jnp.dot(x_ref[...], wih_ref[...],
                        preferred_element_type=jnp.float32)        # (T, 4H)

        whh = whh_ref[...]                                         # (H, 4H)
        h = jnp.zeros((1, H), jnp.float32)
        c = jnp.zeros((1, H), jnp.float32)

        # Statically unrolled: T is tiny.  For large T switch to lax.fori_loop
        # with h/c carried and xproj chunked to bound VMEM / compile time.
        for t in range(T):
            gates = xproj[t:t + 1, :] + jnp.dot(
                h, whh, preferred_element_type=jnp.float32)        # (1, 4H)
            # One full-vreg sigmoid and one full-vreg tanh (EUP), then lane
            # slices.  PyTorch gate order: i, f, g, o.
            sig = jax.nn.sigmoid(gates)
            tnh = jnp.tanh(gates)
            i_g = sig[:, 0 * H:1 * H]
            f_g = sig[:, 1 * H:2 * H]
            g_g = tnh[:, 2 * H:3 * H]
            o_g = sig[:, 3 * H:4 * H]
            c = f_g * c + i_g * g_g
            h = o_g * jnp.tanh(c)
            # Store this step's hidden row; off the h/c dependence chain.
            hs_ref[pl.ds(t, 1), :] = h

        # Folded head: Linear(H,100)->Linear(100,1) == (T,H) . (H,1) + b.
        # Done as VPU multiply + XLU lane reduce (no N=1 MXU matmul).
        hs = hs_ref[...]                                           # (T, H)
        s = jnp.sum(hs * wh_ref[...], axis=-1, keepdims=True) + bh_ref[0]
        out_ref[...] = jnp.maximum(s, 0.0).astype(out_ref.dtype)   # (T, 1)

    return kernel


def model_forward(stock_price, params):
    """stock_price: (T, B, I) float32 -> (T, 1) float32."""
    x = stock_price.astype(jnp.float32)
    T, B, I = x.shape
    H = params["w_hh"].shape[1]

    # ---- glue (weight layout prep, outside the kernel) ----
    # out[:, -1, :] only reads batch row B-1 and the LSTM recurrence is
    # batch-independent, so feed only that row to the kernel.
    x_last = x[:, B - 1, :]                                        # (T, I)
    x_aug = jnp.concatenate(
        [x_last, jnp.ones((T, 1), jnp.float32)], axis=1)           # (T, I+1)

    gate_bias = (params["b_ih"] + params["b_hh"]).reshape(1, 4 * H)
    wih_aug = jnp.concatenate(
        [params["w_ih"].T.astype(jnp.float32),
         gate_bias.astype(jnp.float32)], axis=0)                   # (I+1, 4H)
    whh_t = params["w_hh"].T.astype(jnp.float32)                   # (H, 4H)

    # Fold the two Linears (no nonlinearity between them) into one row + scalar.
    w1 = params["w1"].astype(jnp.float32)                          # (100, H)
    b1 = params["b1"].astype(jnp.float32)                          # (100,)
    w2 = params["w2"].astype(jnp.float32)                          # (1, 100)
    b2 = params["b2"].astype(jnp.float32)                          # (1,)
    w_head = (w2 @ w1)                                             # (1, H)
    b_head = (w2 @ b1 + b2).reshape(1)                             # (1,)

    kernel = make_fused_kernel(T, H)
    return pl.pallas_call(
        kernel,
        out_shape=jax.ShapeDtypeStruct((T, 1), jnp.float32),
        grid=(1,),
        in_specs=[
            pl.BlockSpec((T, I + 1), lambda i: (0, 0)),
            pl.BlockSpec((I + 1, 4 * H), lambda i: (0, 0)),
            pl.BlockSpec((H, 4 * H), lambda i: (0, 0)),
            pl.BlockSpec((1, H), lambda i: (0, 0)),
            pl.BlockSpec(memory_space=pltpu.MemorySpace.SMEM),     # scalar bias
        ],
        out_specs=pl.BlockSpec((T, 1), lambda i: (0, 0)),
        scratch_shapes=[pltpu.VMEM((T, H), jnp.float32)],
    )(x_aug, wih_aug, whh_t, w_head, b_head)


# ----------------------- pure-JAX reference (check) -------------------------
def reference_forward(x, p):
    T, B, I = x.shape
    H = p["w_hh"].shape[1]
    h = jnp.zeros((B, H), jnp.float32)
    c = jnp.zeros((B, H), jnp.float32)
    outs = []
    for t in range(T):
        g = x[t] @ p["w_ih"].T + p["b_ih"] + h @ p["w_hh"].T + p["b_hh"]
        i_g = jax.nn.sigmoid(g[:, 0 * H:1 * H])
        f_g = jax.nn.sigmoid(g[:, 1 * H:2 * H])
        g_g = jnp.tanh(g[:, 2 * H:3 * H])
        o_g = jax.nn.sigmoid(g[:, 3 * H:4 * H])
        c = f_g * c + i_g * g_g
        h = o_g * jnp.tanh(c)
        outs.append(h)
    lstm_out = jnp.stack(outs, axis=0)            # (T, B, H)
    o = lstm_out[:, -1, :]                        # (T, H)   same slice as torch
    o = o @ p["w1"].T + p["b1"]
    o = o @ p["w2"].T + p["b2"]
    return jnp.maximum(o, 0.0)


# --------------------------------- main --------------------------------------
if __name__ == "__main__":
    seq_len, batch, input_size, hidden = 8, 2, 4, 32

    key = jax.random.PRNGKey(0)
    stdv = 1.0 / math.sqrt(hidden)
    ks = jax.random.split(key, 10)

    def u(k, shape):
        return jax.random.uniform(k, shape, jnp.float32, -stdv, stdv)

    params = {
        "w_ih": u(ks[0], (4 * hidden, input_size)),
        "w_hh": u(ks[1], (4 * hidden, hidden)),
        "b_ih": u(ks[2], (4 * hidden,)),
        "b_hh": u(ks[3], (4 * hidden,)),
        "w1":   u(ks[4], (100, hidden)),
        "b1":   u(ks[5], (100,)),
        "w2":   u(ks[6], (1, 100)),
        "b2":   u(ks[7], (1,)),
    }

    x = jax.random.normal(ks[8], (seq_len, batch, input_size), jnp.float32)

    out = model_forward(x, params)
    out = jax.block_until_ready(out)

    ref = reference_forward(x, params)
    assert out.shape == (seq_len, 1), out.shape
    assert jnp.allclose(out, ref, atol=1e-5, rtol=1e-5), (out, ref)

    print("KERNEL_OK")
</pallas_src>

<mosaic_0001>
module attributes {stable_mosaic.version = 11 : i64} {
  func.func @kernel(%arg0: i32, %arg1: memref<8x5xf32, #tpu.memory_space<vmem>>, %arg2: memref<5x128xf32, #tpu.memory_space<vmem>>, %arg3: memref<32x128xf32, #tpu.memory_space<vmem>>, %arg4: memref<1x32xf32, #tpu.memory_space<vmem>>, %arg5: memref<1xf32, #tpu.memory_space<smem>>, %arg6: memref<8x1xf32, #tpu.memory_space<vmem>>, %arg7: memref<8x32xf32, #tpu.memory_space<vmem>>) attributes {dimension_semantics = [#tpu.dimension_semantics<arbitrary>], iteration_bounds = array<i64: 1>, scalar_prefetch = 0 : i64, scratch_operands = 1 : i64, tpu.core_type = #tpu.core_type<tc>, window_params = [{pipeline_mode = #tpu.pipeline_mode<synchronous>, transform_indices = @transform_0, window_bounds = array<i64: 8, 5>}, {pipeline_mode = #tpu.pipeline_mode<synchronous>, transform_indices = @transform_1, window_bounds = array<i64: 5, 128>}, {pipeline_mode = #tpu.pipeline_mode<synchronous>, transform_indices = @transform_2, window_bounds = array<i64: 32, 128>}, {pipeline_mode = #tpu.pipeline_mode<synchronous>, transform_indices = @transform_3, window_bounds = array<i64: 1, 32>}, {transform_indices = @transform_4, window_bounds = array<i64: 1>}, {pipeline_mode = #tpu.pipeline_mode<synchronous>, transform_indices = @transform_5, window_bounds = array<i64: 8, 1>}]} {
    %c0 = arith.constant 0 : index
    %c0_0 = arith.constant 0 : index
    %0 = vector.load %arg1[%c0, %c0_0] : memref<8x5xf32, #tpu.memory_space<vmem>>, vector<8x5xf32>
    %c0_1 = arith.constant 0 : index
    %c0_2 = arith.constant 0 : index
    %1 = vector.load %arg2[%c0_1, %c0_2] : memref<5x128xf32, #tpu.memory_space<vmem>>, vector<5x128xf32>
    %cst = arith.constant dense<0.000000e+00> : vector<8x128xf32>
    %2 = tpu.matmul %0, %1, %cst {dimension_numbers = #tpu.dot_dimension_numbers<[1], [0], [0], [1], [0, 0, 1, 1], [], []>} : vector<8x5xf32>, vector<5x128xf32>, vector<8x128xf32> -> vector<8x128xf32>
    %c0_3 = arith.constant 0 : index
    %c0_4 = arith.constant 0 : index
    %3 = vector.load %arg3[%c0_3, %c0_4] : memref<32x128xf32, #tpu.memory_space<vmem>>, vector<32x128xf32>
    %cst_5 = arith.constant 0.000000e+00 : f32
    %4 = vector.broadcast %cst_5 : f32 to vector<1x32xf32>
    %cst_6 = arith.constant 0.000000e+00 : f32
    %5 = vector.broadcast %cst_6 : f32 to vector<1x32xf32>
    %6 = vector.extract_strided_slice %2 {offsets = [0, 0], sizes = [1, 128], strides = [1, 1]} : vector<8x128xf32> to vector<1x128xf32>
    %cst_7 = arith.constant dense<0.000000e+00> : vector<1x128xf32>
    %7 = tpu.matmul %4, %3, %cst_7 {dimension_numbers = #tpu.dot_dimension_numbers<[1], [0], [0], [1], [0, 0, 1, 1], [], []>} : vector<1x32xf32>, vector<32x128xf32>, vector<1x128xf32> -> vector<1x128xf32>
    %8 = arith.addf %6, %7 : vector<1x128xf32>
    %9 = arith.negf %8 : vector<1x128xf32>
    %10 = math.exp %9 : vector<1x128xf32>
    %cst_8 = arith.constant 1.000000e+00 : f32
    %11 = vector.broadcast %cst_8 : f32 to vector<1x128xf32>
    %12 = arith.addf %11, %10 : vector<1x128xf32>
    %13 = arith.divf %11, %12 : vector<1x128xf32>
    %14 = math.tanh %8 : vector<1x128xf32>
    %15 = vector.extract_strided_slice %13 {offsets = [0, 0], sizes = [1, 32], strides = [1, 1]} : vector<1x128xf32> to vector<1x32xf32>
    %16 = vector.extract_strided_slice %13 {offsets = [0, 32], sizes = [1, 32], strides = [1, 1]} : vector<1x128xf32> to vector<1x32xf32>
    %17 = vector.extract_strided_slice %14 {offsets = [0, 64], sizes = [1, 32], strides = [1, 1]} : vector<1x128xf32> to vector<1x32xf32>
    %18 = vector.extract_strided_slice %13 {offsets = [0, 96], sizes = [1, 32], strides = [1, 1]} : vector<1x128xf32> to vector<1x32xf32>
    %19 = arith.mulf %16, %5 : vector<1x32xf32>
    %20 = arith.mulf %15, %17 : vector<1x32xf32>
    %21 = arith.addf %19, %20 : vector<1x32xf32>
    %22 = math.tanh %21 : vector<1x32xf32>
    %23 = arith.mulf %18, %22 : vector<1x32xf32>
    %c0_9 = arith.constant 0 : index
    %c0_10 = arith.constant 0 : index
    %24 = vector.load %arg7[%c0_9, %c0_10] : memref<8x32xf32, #tpu.memory_space<vmem>>, vector<1x32xf32>
    tpu.vector_store %arg7[%c0_9, %c0_10], %23 {strides = array<i32>} : memref<8x32xf32, #tpu.memory_space<vmem>>, vector<1x32xf32>,
    %25 = vector.extract_strided_slice %2 {offsets = [1, 0], sizes = [1, 128], strides = [1, 1]} : vector<8x128xf32> to vector<1x128xf32>
    %cst_11 = arith.constant dense<0.000000e+00> : vector<1x128xf32>
    %26 = tpu.matmul %23, %3, %cst_11 {dimension_numbers = #tpu.dot_dimension_numbers<[1], [0], [0], [1], [0, 0, 1, 1], [], []>} : vector<1x32xf32>, vector<32x128xf32>, vector<1x128xf32> -> vector<1x128xf32>
    %27 = arith.addf %25, %26 : vector<1x128xf32>
    %28 = arith.negf %27 : vector<1x128xf32>
    %29 = math.exp %28 : vector<1x128xf32>
    %cst_12 = arith.constant 1.000000e+00 : f32
    %30 = vector.broadcast %cst_12 : f32 to vector<1x128xf32>
    %31 = arith.addf %30, %29 : vector<1x128xf32>
    %32 = arith.divf %30, %31 : vector<1x128xf32>
    %33 = math.tanh %27 : vector<1x128xf32>
    %34 = vector.extract_strided_slice %32 {offsets = [0, 0], sizes = [1, 32], strides = [1, 1]} : vector<1x128xf32> to vector<1x32xf32>
    %35 = vector.extract_strided_slice %32 {offsets = [0, 32], sizes = [1, 32], strides = [1, 1]} : vector<1x128xf32> to vector<1x32xf32>
    %36 = vector.extract_strided_slice %33 {offsets = [0, 64], sizes = [1, 32], strides = [1, 1]} : vector<1x128xf32> to vector<1x32xf32>
    %37 = vector.extract_strided_slice %32 {offsets = [0, 96], sizes = [1, 32], strides = [1, 1]} : vector<1x128xf32> to vector<1x32xf32>
    %38 = arith.mulf %35, %21 : vector<1x32xf32>
    %39 = arith.mulf %34, %36 : vector<1x32xf32>
    %40 = arith.addf %38, %39 : vector<1x32xf32>
    %41 = math.tanh %40 : vector<1x32xf32>
    %42 = arith.mulf %37, %41 : vector<1x32xf32>
    %c1 = arith.constant 1 : index
    %c0_13 = arith.constant 0 : index
    %43 = vector.load %arg7[%c1, %c0_13] : memref<8x32xf32, #tpu.memory_space<vmem>>, vector<1x32xf32>
    tpu.vector_store %arg7[%c1, %c0_13], %42 {strides = array<i32>} : memref<8x32xf32, #tpu.memory_space<vmem>>, vector<1x32xf32>,
    %44 = vector.extract_strided_slice %2 {offsets = [2, 0], sizes = [1, 128], strides = [1, 1]} : vector<8x128xf32> to vector<1x128xf32>
    %cst_14 = arith.constant dense<0.000000e+00> : vector<1x128xf32>
    %45 = tpu.matmul %42, %3, %cst_14 {dimension_numbers = #tpu.dot_dimension_numbers<[1], [0], [0], [1], [0, 0, 1, 1], [], []>} : vector<1x32xf32>, vector<32x128xf32>, vector<1x128xf32> -> vector<1x128xf32>
    %46 = arith.addf %44, %45 : vector<1x128xf32>
    %47 = arith.negf %46 : vector<1x128xf32>
    %48 = math.exp %47 : vector<1x128xf32>
    %cst_15 = arith.constant 1.000000e+00 : f32
    %49 = vector.broadcast %cst_15 : f32 to vector<1x128xf32>
    %50 = arith.addf %49, %48 : vector<1x128xf32>
    %51 = arith.divf %49, %50 : vector<1x128xf32>
    %52 = math.tanh %46 : vector<1x128xf32>
    %53 = vector.extract_strided_slice %51 {offsets = [0, 0], sizes = [1, 32], strides = [1, 1]} : vector<1x128xf32> to vector<1x32xf32>
    %54 = vector.extract_strided_slice %51 {offsets = [0, 32], sizes = [1, 32], strides = [1, 1]} : vector<1x128xf32> to vector<1x32xf32>
    %55 = vector.extract_strided_slice %52 {offsets = [0, 64], sizes = [1, 32], strides = [1, 1]} : vector<1x128xf32> to vector<1x32xf32>
    %56 = vector.extract_strided_slice %51 {offsets = [0, 96], sizes = [1, 32], strides = [1, 1]} : vector<1x128xf32> to vector<1x32xf32>
    %57 = arith.mulf %54, %40 : vector<1x32xf32>
    %58 = arith.mulf %53, %55 : vector<1x32xf32>
    %59 = arith.addf %57, %58 : vector<1x32xf32>
    %60 = math.tanh %59 : vector<1x32xf32>
    %61 = arith.mulf %56, %60 : vector<1x32xf32>
    %c2 = arith.constant 2 : index
    %c0_16 = arith.constant 0 : index
    %62 = vector.load %arg7[%c2, %c0_16] : memref<8x32xf32, #tpu.memory_space<vmem>>, vector<1x32xf32>
    tpu.vector_store %arg7[%c2, %c0_16], %61 {strides = array<i32>} : memref<8x32xf32, #tpu.memory_space<vmem>>, vector<1x32xf32>,
    %63 = vector.extract_strided_slice %2 {offsets = [3, 0], sizes = [1, 128], strides = [1, 1]} : vector<8x128xf32> to vector<1x128xf32>
    %cst_17 = arith.constant dense<0.000000e+00> : vector<1x128xf32>
    %64 = tpu.matmul %61, %3, %cst_17 {dimension_numbers = #tpu.dot_dimension_numbers<[1], [0], [0], [1], [0, 0, 1, 1], [], []>} : vector<1x32xf32>, vector<32x128xf32>, vector<1x128xf32> -> vector<1x128xf32>
    %65 = arith.addf %63, %64 : vector<1x128xf32>
    %66 = arith.negf %65 : vector<1x128xf32>
    %67 = math.exp %66 : vector<1x128xf32>
    %cst_18 = arith.constant 1.000000e+00 : f32
    %68 = vector.broadcast %cst_18 : f32 to vector<1x128xf32>
    %69 = arith.addf %68, %67 : vector<1x128xf32>
    %70 = arith.divf %68, %69 : vector<1x128xf32>
    %71 = math.tanh %65 : vector<1x128xf32>
    %72 = vector.extract_strided_slice %70 {offsets = [0, 0], sizes = [1, 32], strides = [1, 1]} : vector<1x128xf32> to vector<1x32xf32>
    %73 = vector.extract_strided_slice %70 {offsets = [0, 32], sizes = [1, 32], strides = [1, 1]} : vector<1x128xf32> to vector<1x32xf32>
    %74 = vector.extract_strided_slice %71 {offsets = [0, 64], sizes = [1, 32], strides = [1, 1]} : vector<1x128xf32> to vector<1x32xf32>
    %75 = vector.extract_strided_slice %70 {offsets = [0, 96], sizes = [1, 32], strides = [1, 1]} : vector<1x128xf32> to vector<1x32xf32>
    %76 = arith.mulf %73, %59 : vector<1x32xf32>
    %77 = arith.mulf %72, %74 : vector<1x32xf32>
    %78 = arith.addf %76, %77 : vector<1x32xf32>
    %79 = math.tanh %78 : vector<1x32xf32>
    %80 = arith.mulf %75, %79 : vector<1x32xf32>
    %c3 = arith.constant 3 : index
    %c0_19 = arith.constant 0 : index
    %81 = vector.load %arg7[%c3, %c0_19] : memref<8x32xf32, #tpu.memory_space<vmem>>, vector<1x32xf32>
    tpu.vector_store %arg7[%c3, %c0_19], %80 {strides = array<i32>} : memref<8x32xf32, #tpu.memory_space<vmem>>, vector<1x32xf32>,
    %82 = vector.extract_strided_slice %2 {offsets = [4, 0], sizes = [1, 128], strides = [1, 1]} : vector<8x128xf32> to vector<1x128xf32>
    %cst_20 = arith.constant dense<0.000000e+00> : vector<1x128xf32>
    %83 = tpu.matmul %80, %3, %cst_20 {dimension_numbers = #tpu.dot_dimension_numbers<[1], [0], [0], [1], [0, 0, 1, 1], [], []>} : vector<1x32xf32>, vector<32x128xf32>, vector<1x128xf32> -> vector<1x128xf32>
    %84 = arith.addf %82, %83 : vector<1x128xf32>
    %85 = arith.negf %84 : vector<1x128xf32>
    %86 = math.exp %85 : vector<1x128xf32>
    %cst_21 = arith.constant 1.000000e+00 : f32
    %87 = vector.broadcast %cst_21 : f32 to vector<1x128xf32>
    %88 = arith.addf %87, %86 : vector<1x128xf32>
    %89 = arith.divf %87, %88 : vector<1x128xf32>
    %90 = math.tanh %84 : vector<1x128xf32>
    %91 = vector.extract_strided_slice %89 {offsets = [0, 0], sizes = [1, 32], strides = [1, 1]} : vector<1x128xf32> to vector<1x32xf32>
    %92 = vector.extract_strided_slice %89 {offsets = [0, 32], sizes = [1, 32], strides = [1, 1]} : vector<1x128xf32> to vector<1x32xf32>
    %93 = vector.extract_strided_slice %90 {offsets = [0, 64], sizes = [1, 32], strides = [1, 1]} : vector<1x128xf32> to vector<1x32xf32>
    %94 = vector.extract_strided_slice %89 {offsets = [0, 96], sizes = [1, 32], strides = [1, 1]} : vector<1x128xf32> to vector<1x32xf32>
    %95 = arith.mulf %92, %78 : vector<1x32xf32>
    %96 = arith.mulf %91, %93 : vector<1x32xf32>
    %97 = arith.addf %95, %96 : vector<1x32xf32>
    %98 = math.tanh %97 : vector<1x32xf32>
    %99 = arith.mulf %94, %98 : vector<1x32xf32>
    %c4 = arith.constant 4 : index
    %c0_22 = arith.constant 0 : index
    %100 = vector.load %arg7[%c4, %c0_22] : memref<8x32xf32, #tpu.memory_space<vmem>>, vector<1x32xf32>
    tpu.vector_store %arg7[%c4, %c0_22], %99 {strides = array<i32>} : memref<8x32xf32, #tpu.memory_space<vmem>>, vector<1x32xf32>,
    %101 = vector.extract_strided_slice %2 {offsets = [5, 0], sizes = [1, 128], strides = [1, 1]} : vector<8x128xf32> to vector<1x128xf32>
    %cst_23 = arith.constant dense<0.000000e+00> : vector<1x128xf32>
    %102 = tpu.matmul %99, %3, %cst_23 {dimension_numbers = #tpu.dot_dimension_numbers<[1], [0], [0], [1], [0, 0, 1, 1], [], []>} : vector<1x32xf32>, vector<32x128xf32>, vector<1x128xf32> -> vector<1x128xf32>
    %103 = arith.addf %101, %102 : vector<1x128xf32>
    %104 = arith.negf %103 : vector<1x128xf32>
    %105 = math.exp %104 : vector<1x128xf32>
    %cst_24 = arith.constant 1.000000e+00 : f32
    %106 = vector.broadcast %cst_24 : f32 to vector<1x128xf32>
    %107 = arith.addf %106, %105 : vector<1x128xf32>
    %108 = arith.divf %106, %107 : vector<1x128xf32>
    %109 = math.tanh %103 : vector<1x128xf32>
    %110 = vector.extract_strided_slice %108 {offsets = [0, 0], sizes = [1, 32], strides = [1, 1]} : vector<1x128xf32> to vector<1x32xf32>
    %111 = vector.extract_strided_slice %108 {offsets = [0, 32], sizes = [1, 32], strides = [1, 1]} : vector<1x128xf32> to vector<1x32xf32>
    %112 = vector.extract_strided_slice %109 {offsets = [0, 64], sizes = [1, 32], strides = [1, 1]} : vector<1x128xf32> to vector<1x32xf32>
    %113 = vector.extract_strided_slice %108 {offsets = [0, 96], sizes = [1, 32], strides = [1, 1]} : vector<1x128xf32> to vector<1x32xf32>
    %114 = arith.mulf %111, %97 : vector<1x32xf32>
    %115 = arith.mulf %110, %112 : vector<1x32xf32>
    %116 = arith.addf %114, %115 : vector<1x32xf32>
    %117 = math.tanh %116 : vector<1x32xf32>
    %118 = arith.mulf %113, %117 : vector<1x32xf32>
    %c5 = arith.constant 5 : index
    %c0_25 = arith.constant 0 : index
    %119 = vector.load %arg7[%c5, %c0_25] : memref<8x32xf32, #tpu.memory_space<vmem>>, vector<1x32xf32>
    tpu.vector_store %arg7[%c5, %c0_25], %118 {strides = array<i32>} : memref<8x32xf32, #tpu.memory_space<vmem>>, vector<1x32xf32>,
    %120 = vector.extract_strided_slice %2 {offsets = [6, 0], sizes = [1, 128], strides = [1, 1]} : vector<8x128xf32> to vector<1x128xf32>
    %cst_26 = arith.constant dense<0.000000e+00> : vector<1x128xf32>
    %121 = tpu.matmul %118, %3, %cst_26 {dimension_numbers = #tpu.dot_dimension_numbers<[1], [0], [0], [1], [0, 0, 1, 1], [], []>} : vector<1x32xf32>, vector<32x128xf32>, vector<1x128xf32> -> vector<1x128xf32>
    %122 = arith.addf %120, %121 : vector<1x128xf32>
    %123 = arith.negf %122 : vector<1x128xf32>
    %124 = math.exp %123 : vector<1x128xf32>
    %cst_27 = arith.constant 1.000000e+00 : f32
    %125 = vector.broadcast %cst_27 : f32 to vector<1x128xf32>
    %126 = arith.addf %125, %124 : vector<1x128xf32>
    %127 = arith.divf %125, %126 : vector<1x128xf32>
    %128 = math.tanh %122 : vector<1x128xf32>
    %129 = vector.extract_strided_slice %127 {offsets = [0, 0], sizes = [1, 32], strides = [1, 1]} : vector<1x128xf32> to vector<1x32xf32>
    %130 = vector.extract_strided_slice %127 {offsets = [0, 32], sizes = [1, 32], strides = [1, 1]} : vector<1x128xf32> to vector<1x32xf32>
    %131 = vector.extract_strided_slice %128 {offsets = [0, 64], sizes = [1, 32], strides = [1, 1]} : vector<1x128xf32> to vector<1x32xf32>
    %132 = vector.extract_strided_slice %127 {offsets = [0, 96], sizes = [1, 32], strides = [1, 1]} : vector<1x128xf32> to vector<1x32xf32>
    %133 = arith.mulf %130, %116 : vector<1x32xf32>
    %134 = arith.mulf %129, %131 : vector<1x32xf32>
    %135 = arith.addf %133, %134 : vector<1x32xf32>
    %136 = math.tanh %135 : vector<1x32xf32>
    %137 = arith.mulf %132, %136 : vector<1x32xf32>
    %c6 = arith.constant 6 : index
    %c0_28 = arith.constant 0 : index
    %138 = vector.load %arg7[%c6, %c0_28] : memref<8x32xf32, #tpu.memory_space<vmem>>, vector<1x32xf32>
    tpu.vector_store %arg7[%c6, %c0_28], %137 {strides = array<i32>} : memref<8x32xf32, #tpu.memory_space<vmem>>, vector<1x32xf32>,
    %139 = vector.extract_strided_slice %2 {offsets = [7, 0], sizes = [1, 128], strides = [1, 1]} : vector<8x128xf32> to vector<1x128xf32>
    %cst_29 = arith.constant dense<0.000000e+00> : vector<1x128xf32>
    %140 = tpu.matmul %137, %3, %cst_29 {dimension_numbers = #tpu.dot_dimension_numbers<[1], [0], [0], [1], [0, 0, 1, 1], [], []>} : vector<1x32xf32>, vector<32x128xf32>, vector<1x128xf32> -> vector<1x128xf32>
    %141 = arith.addf %139, %140 : vector<1x128xf32>
    %142 = arith.negf %141 : vector<1x128xf32>
    %143 = math.exp %142 : vector<1x128xf32>
    %cst_30 = arith.constant 1.000000e+00 : f32
    %144 = vector.broadcast %cst_30 : f32 to vector<1x128xf32>
    %145 = arith.addf %144, %143 : vector<1x128xf32>
    %146 = arith.divf %144, %145 : vector<1x128xf32>
    %147 = math.tanh %141 : vector<1x128xf32>
    %148 = vector.extract_strided_slice %146 {offsets = [0, 0], sizes = [1, 32], strides = [1, 1]} : vector<1x128xf32> to vector<1x32xf32>
    %149 = vector.extract_strided_slice %146 {offsets = [0, 32], sizes = [1, 32], strides = [1, 1]} : vector<1x128xf32> to vector<1x32xf32>
    %150 = vector.extract_strided_slice %147 {offsets = [0, 64], sizes = [1, 32], strides = [1, 1]} : vector<1x128xf32> to vector<1x32xf32>
    %151 = vector.extract_strided_slice %146 {offsets = [0, 96], sizes = [1, 32], strides = [1, 1]} : vector<1x128xf32> to vector<1x32xf32>
    %152 = arith.mulf %149, %135 : vector<1x32xf32>
    %153 = arith.mulf %148, %150 : vector<1x32xf32>
    %154 = arith.addf %152, %153 : vector<1x32xf32>
    %155 = math.tanh %154 : vector<1x32xf32>
    %156 = arith.mulf %151, %155 : vector<1x32xf32>
    %c7 = arith.constant 7 : index
    %c0_31 = arith.constant 0 : index
    %157 = vector.load %arg7[%c7, %c0_31] : memref<8x32xf32, #tpu.memory_space<vmem>>, vector<1x32xf32>
    tpu.vector_store %arg7[%c7, %c0_31], %156 {strides = array<i32>} : memref<8x32xf32, #tpu.memory_space<vmem>>, vector<1x32xf32>,
    %c0_32 = arith.constant 0 : index
    %c0_33 = arith.constant 0 : index
    %158 = vector.load %arg7[%c0_32, %c0_33] : memref<8x32xf32, #tpu.memory_space<vmem>>, vector<8x32xf32>
    %c0_34 = arith.constant 0 : index
    %c0_35 = arith.constant 0 : index
    %159 = vector.load %arg4[%c0_34, %c0_35] : memref<1x32xf32, #tpu.memory_space<vmem>>, vector<1x32xf32>
    %160 = vector.broadcast %159 : vector<1x32xf32> to vector<8x32xf32>
    %161 = arith.mulf %158, %160 : vector<8x32xf32>
    %cst_36 = arith.constant dense<0.000000e+00> : vector<8xf32>
    %162 = vector.multi_reduction <add>, %161, %cst_36 [1] : vector<8x32xf32> to vector<8xf32>
    %163 = vector.shape_cast %162 : vector<8xf32> to vector<8x1xf32>
    %c0_37 = arith.constant 0 : index
    %164 = memref.load %arg5[%c0_37] : memref<1xf32, #tpu.memory_space<smem>>
    %165 = vector.broadcast %164 : f32 to vector<8x1xf32>
    %166 = arith.addf %163, %165 : vector<8x1xf32>
    %cst_38 = arith.constant 0.000000e+00 : f32
    %167 = vector.broadcast %cst_38 : f32 to vector<8x1xf32>
    %168 = arith.maximumf %166, %167 : vector<8x1xf32>
    %c0_39 = arith.constant 0 : index
    %c0_40 = arith.constant 0 : index
    %169 = vector.load %arg6[%c0_39, %c0_40] : memref<8x1xf32, #tpu.memory_space<vmem>>, vector<8x1xf32>
    tpu.vector_store %arg6[%c0_39, %c0_40], %168 {strides = array<i32>} : memref<8x1xf32, #tpu.memory_space<vmem>>, vector<8x1xf32>,
    return
  }
  func.func @transform_0(%arg0: i32) -> (i32, i32) {
    %c0_i32 = arith.constant 0 : i32
    %c0_i32_0 = arith.constant 0 : i32
    %c0_i32_1 = arith.constant 0 : i32
    return %c0_i32, %c0_i32_0 : i32, i32
  }
  func.func @transform_1(%arg0: i32) -> (i32, i32) {
    %c0_i32 = arith.constant 0 : i32
    %c0_i32_0 = arith.constant 0 : i32
    %c0_i32_1 = arith.constant 0 : i32
    return %c0_i32, %c0_i32_0 : i32, i32
  }
  func.func @transform_2(%arg0: i32) -> (i32, i32) {
    %c0_i32 = arith.constant 0 : i32
    %c0_i32_0 = arith.constant 0 : i32
    %c0_i32_1 = arith.constant 0 : i32
    return %c0_i32, %c0_i32_0 : i32, i32
  }
  func.func @transform_3(%arg0: i32) -> (i32, i32) {
    %c0_i32 = arith.constant 0 : i32
    %c0_i32_0 = arith.constant 0 : i32
    %c0_i32_1 = arith.constant 0 : i32
    return %c0_i32, %c0_i32_0 : i32, i32
  }
  func.func @transform_4(%arg0: i32) -> i32 {
    %c0_i32 = arith.constant 0 : i32
    %c0_i32_0 = arith.constant 0 : i32
    return %c0_i32 : i32
  }
  func.func @transform_5(%arg0: i32) -> (i32, i32) {
    %c0_i32 = arith.constant 0 : i32
    %c0_i32_0 = arith.constant 0 : i32
    %c0_i32_1 = arith.constant 0 : i32
    return %c0_i32, %c0_i32_0 : i32, i32
  }
}

</mosaic_0001>

<bundles_post_ra>
// kernel: tpu_custom_call.1
= control target key start
LH: loop header
LB: loop body
LE: loop exit
PB: predicated region body
PF: predicated region fallthrough
CT: control target
= control target key end

     0   :  { %11 = vsyncpa [#allocation5], 0  ;;  %s1610_s0 = inlined_call_operand.hbm [shape: f32[8,5], index: 0, kind: input, shape index: {}]   ;;  %s1611_s1 = inlined_call_operand.hbm [shape: f32[5,128], index: 1, kind: input, shape index: {}]   ;;  %s1612_s2 = inlined_call_operand.hbm [shape: f32[32,128], index: 2, kind: input, shape index: {}]   ;;  %s1613_s3 = inlined_call_operand.vmem [shape: f32[1,32], index: 3, kind: input, shape index: {}]   ;;  %s1614_s4 = inlined_call_operand.<no memory space> [shape: f32[1], index: 4, kind: input, shape index: {}]   ;;  %s1615_s5 = inlined_call_operand.vmem [shape: f32[8,1], index: 5, kind: output, shape index: {}]  }
   0x1   :  { %12 = vsyncpa [#allocation7], 0  ;;  %s1397_s18 = smov [#allocation6]   ;;  %s1398_s20 = smov [#allocation4]  }
   0x2   :  { %s29_s19 = sshll.u32 %s1397_s18, 4  ;;  %s19_s21 = sshll.u32 %s1398_s20, 4  ;;  %s30_s19 = int_to_ptr.vmem [resolvable:$true] %s29_s19  ;;  %s20_s21 = int_to_ptr.vmem [resolvable:$true] %s19_s21 }
   0x3   :  { %s1327_s24 = scalar_lea.hbm %s1611_s1, 128 }
   0x4   :  { %p1328_p0 = scmp.ne.s32.totalorder %s1611_s1, %s1327_s24  ;;  %p1331_p1 = scmp.lt.u32.totalorder %s1327_s24, %s1611_s1 }
   0x6   :  { %p1333_p2 = pnand %p1331_p1, %p1328_p0 }
   0x8   :  { %1336 = shalt.err (!%p1333_p2)
}
   0x9   :  { %s1337_s29 = scalar_lea.vmem %s30_s19, 128  ;;  %p1342_p4 = scmp.lt.s32.totalorder %s30_s19, %s30_s19 }
   0xa   :  { %p1338_p3 = scmp.ne.s32.totalorder %s30_s19, %s1337_s29  ;;  %p1343_p5 = scmp.lt.s32.totalorder %s1337_s29, %s1337_s29 }
   0xc   :  { %p1344_p6 = por %p1343_p5, %p1342_p4 }
   0xe   :  { %p1345_p7 = pnand %p1344_p6, %p1338_p3 }
  0x10   :  { %1348 = shalt.err (!%p1345_p7)
}
  0x11   :  { %32 = dma.hbm_to_vmem [thread:$0]  %s1611_s1, 128, %s30_s19, [#allocation7]  }
  0x12   :  { %s1349_s9 = scalar_lea.hbm %s1610_s0, 128 }
  0x13   :  { %p1350_p8 = scmp.ne.s32.totalorder %s1610_s0, %s1349_s9  ;;  %p1353_p9 = scmp.lt.u32.totalorder %s1349_s9, %s1610_s0 }
  0x15   :  { %p1355_p10 = pnand %p1353_p9, %p1350_p8 }
  0x17   :  { %1358 = shalt.err (!%p1355_p10)
}
  0x18   :  { %s1359_s14 = scalar_lea.vmem %s20_s21, 128  ;;  %p1364_p12 = scmp.lt.s32.totalorder %s20_s21, %s20_s21 }
  0x19   :  { %p1360_p11 = scmp.ne.s32.totalorder %s20_s21, %s1359_s14  ;;  %p1365_p13 = scmp.lt.s32.totalorder %s1359_s14, %s1359_s14 }
  0x1b   :  { %p1366_p0 = por %p1365_p13, %p1364_p12 }
  0x1d   :  { %p1367_p1 = pnand %p1366_p0, %p1360_p11 }
  0x1f   :  { %1370 = shalt.err (!%p1367_p1)
}
  0x20   :  { %22 = dma.hbm_to_vmem [thread:$0]  %s1610_s0, 128, %s20_s21, [#allocation5]  }
  0x21   :  { %s1399_s16 = smov [#allocation8]   ;;  %s1371_s20 = scalar_lea.hbm %s1612_s2, 512 }
  0x22   :  { %s38_s17 = sshll.u32 %s1399_s16, 4  ;;  %p1372_p2 = scmp.ne.s32.totalorder %s1612_s2, %s1371_s20  ;;  %s39_s17 = int_to_ptr.vmem [resolvable:$true] %s38_s17 }
  0x23   :  { %p1375_p3 = scmp.lt.u32.totalorder %s1371_s20, %s1612_s2 }
  0x25   :  { %p1377_p4 = pnand %p1375_p3, %p1372_p2 }
  0x27   :  { %1380 = shalt.err (!%p1377_p4)
}
  0x28   :  { %s1381_s26 = scalar_lea.vmem %s39_s17, 512  ;;  %p1386_p6 = scmp.lt.s32.totalorder %s39_s17, %s39_s17 }
  0x29   :  { %p1382_p5 = scmp.ne.s32.totalorder %s39_s17, %s1381_s26  ;;  %p1387_p7 = scmp.lt.s32.totalorder %s1381_s26, %s1381_s26 }
  0x2b   :  { %p1388_p8 = por %p1387_p7, %p1386_p6 }
  0x2d   :  { %p1389_p9 = pnand %p1388_p8, %p1382_p5 }
  0x2f   :  { %1392 = shalt.err (!%p1389_p9)
}
  0x30   :  { %s1400_s0 = smov 128   ;;  %s1401_s21 = smov 8  }
  0x31   :  { %44 = dma.hbm_to_vmem [thread:$0]  %s1612_s2, 512, %s39_s17, [#allocation7], %s1400_s0, %s1400_s0, %s1401_s21  }
  0x32   :  { %1393 = dma.done.wait [#allocation5], 128  }
  0x33   :  { %1394 = vsyncadd [#allocation5], 4294967168 }
  0x34   :  { %1395 = dma.done.wait [#allocation7], 640  }
  0x35   :  { %1396 = vsyncadd [#allocation7], 4294966656  ;;  %v1402_v0 = vmov 0.0|0.0   ;;  %v1403_v1 = vmov 0.0   ;;  %vm1404_vm0 = vmmov 0   ;;  %vm64_vm1 = vcmask 1044480  }
  0x36   :  { %1205 = vmatprep.subr.bf16.mxu1 %v1402_v0  ;;  %1112 = vmatprep.subr.mxu0 %v1403_v1  ;;  %v138_v2 = vld [vmem:[#allocation8] sm:$0xff]  ;;  %v139_v3 = vld [vmem:[#allocation8 + $0x8] sm:$0xff]  ;;  %v140_v4 = vld [vmem:[#allocation8 + $0x10] sm:$0xff]  ;;  %vm60_vm2 = vcmask 39936   ;;  %s1405_s2 = smov 64   ;;  %s1406_s29 = smov 32  }
  0x37   :  { %1114 = vmatprep.mubr.msk.f32.mxu0 %vm1404_vm0, %v1403_v1  ;;  %1125 = vmatprep.mubr.msk.f32.mxu1 %vm1404_vm0, %v1403_v1  ;;  %v1479_v5 = vpack.c.bf16 %v139_v3, %v138_v2  ;;  %v141_v6 = vld [vmem:[#allocation8 + $0x18] sm:$0xff]  ;;  %v58_v8 = vld [vmem:[#allocation4] sm:$0xff]  ;;  %vm245_vm3 = vcmask 253952   ;;  %vm142_vm4 = vcmask 261120   ;;  %vm354_vm5 = vcmask 254977  }
  0x38   :  { %v59_v7 = vld [vmem:[#allocation6] sm:$0x1f]  ;;  %v1482_v9 = vpack.c.bf16 %v141_v6, %v140_v4  ;;  %vm578_vm6 = vcmask 257027   ;;  %vm802_vm7 = vcmask 259077   ;;  %vm466_vm8 = vcmask 256002  }
  0x39   :  { %1113 = vmatpush3.msk.msra.mxu0 %vm64_vm1, %v59_v7  ;;  %1207 = vmatpush3.bf16.msra.mxu1 %v1479_v5  ;;  %vm690_vm9 = vcmask 258052   ;;  %vm914_vm10 = vcmask 260102   ;;  %vm1026_vm11 = vcmask 261127   ;;  %vm1044_vm12 = vcmask 7168  }
  0x3a   :  { %1115 = vmatmul.mubr.msk.f32.vlgmr.msra.gmra.mrb[0].mxu0 %vm60_vm2, %v58_v8  ;;  %1208 = vmatprep.subr.bf16.mxu1 %v1402_v0 }
  0x3b   :  { %1211 = vmatprep.subr.bf16.mxu0 %v1402_v0  ;;  %1136 = vmatprep.mubr.msk.f32.mxu0 %vm1404_vm0, %v1403_v1 }
  0x3c   :  { %1213 = vmatpush3.bf16.msra.mxu0 %v1479_v5 }
  0x3d   :  { %1214 = vmatprep.subr.bf16.mxu0 %v1402_v0  ;;  %1210 = vmatpush3.bf16.msra.mxu1 %v1482_v9 }
  0x3e   :  { %1217 = vmatprep.subr.bf16.mxu1 %v1402_v0 }
  0x40   :  { %1216 = vmatpush3.bf16.msra.mxu0 %v1482_v9  ;;  %1126 = vmatmul.mubr.f32.vlgmr.msra.gmra.mrb[0].mxu1 %v1403_v1 }
  0x41   :  { %1223 = vmatprep.subr.bf16.mxu0 %v1402_v0  ;;  %1219 = vmatpush3.bf16.msra.mxu1 %v1479_v5 }
  0x42   :  { %1147 = vmatprep.mubr.msk.f32.mxu1 %vm1404_vm0, %v1403_v1  ;;  %1220 = vmatprep.subr.bf16.mxu1 %v1402_v0 }
  0x45   :  { %1222 = vmatpush3.bf16.msra.mxu1 %v1482_v9 }
  0x46   :  { %1229 = vmatprep.subr.bf16.mxu1 %v1402_v0 }
 0x10d   :  { %v1501_v10 = vpop.f32.mrb[0].mxu0 }
 0x10e   :  { %v1116_v11 = vpop.f32.mrb[1].mxu0 }
 0x113   :  { %v212_v12 = vpop.f32.mrb[0].mxu1 }
 0x114   :  { %v216_v13 = vadd.f32 %v212_v12, %v1501_v10  ;;  %v1127_v14 = vpop.f32.mrb[1].mxu1 }
 0x116   :  { %1263 = vtanh.f32 %v216_v13  ;;  %v1054_v16 = vmul.f32 -1.442695, %v216_v13 }
 0x118   :  { %1265 = vpow2.f32 %v1054_v16 }
 0x120   :  { %v1264_v15 = vpop.eup %1263 }
 0x121   :  { %226 = vrot.lane.b32.xlu0 %v1264_v15, %s1405_s2 }
 0x122   :  { %v1266_v17 = vpop.eup %1265 }
 0x123   :  { %v220_v18 = vadd.f32 1.0, %v1266_v17 }
 0x125   :  { %1267 = vrcp.f32 %v220_v18 }
 0x12f   :  { %v1268_v19 = vpop.eup %1267 }
 0x130   :  { %v224_v22 = vmul.f32 0.0, %v1268_v19 }
 0x193   :  { %v227_v20 = vpop.permute.xlu0 %226 }
 0x194   :  { %v229_v21 = vmul.f32 %v1268_v19, %v227_v20 }
 0x196   :  { %231 = vrot.lane.b32.xlu0 %v229_v21, %s1406_s29 }
 0x208   :  { %v232_v23 = vpop.permute.xlu0 %231 }
 0x209   :  { %v234_v24 = vadd.f32 %v232_v23, %v224_v22 }
 0x20b   :  { %1269 = vtanh.f32 %v234_v24  ;;  %v331_v40 = vrot.slane %v234_v24, 7 }
 0x215   :  { %v1270_v25 = vpop.eup %1269 }
 0x216   :  { %237 = vrot.lane.b32.xlu1 %v1270_v25, %s1405_s2 }
 0x288   :  { %v238_v26 = vpop.permute.xlu1 %237 }
 0x289   :  { %v240_v27 = vmul.f32 %v1268_v19, %v238_v26 }
 0x28b   :  { %242 = vrot.lane.b32.xlu1 %v240_v27, %s1406_s29 }
 0x2fd   :  { %v243_v28 = vpop.permute.xlu1 %242 }
 0x2fe   :  { %246 = vst.msk [vmem:[#allocation2] sm:$0x1] %vm245_vm3, %v243_v28  ;;  %1137 = vmatmul.mubr.msk.f32.vlgmr.msra.gmra.mrb[2].mxu0 %vm142_vm4, %v243_v28 }
 0x2ff   :  { %1225 = vmatpush3.bf16.msra.mxu0 %v1479_v5  ;;  %1158 = vmatprep.mubr.msk.f32.mxu0 %vm1404_vm0, %v1403_v1 }
 0x300   :  { %1226 = vmatprep.subr.bf16.mxu0 %v1402_v0 }
 0x303   :  { %1228 = vmatpush3.bf16.msra.mxu0 %v1482_v9 }
 0x304   :  { %1235 = vmatprep.subr.bf16.mxu0 %v1402_v0 }
 0x3d1   :  { %v315_v29 = vpop.f32.mrb[2].mxu0 }
 0x3d2   :  { %v320_v30 = vrot.slane %v315_v29, 7  ;;  %v1138_v31 = vpop.f32.mrb[3].mxu0 }
 0x3d4   :  { %v322_v32 = vadd.f32 %v320_v30, %v1501_v10 }
 0x3d6   :  { %1271 = vtanh.f32 %v322_v32  ;;  %v1056_v34 = vmul.f32 -1.442695, %v322_v32 }
 0x3d8   :  { %1273 = vpow2.f32 %v1056_v34 }
 0x3e0   :  { %v1272_v33 = vpop.eup %1271 }
 0x3e1   :  { %335 = vrot.lane.b32.xlu0 %v1272_v33, %s1405_s2 }
 0x3e2   :  { %v1274_v35 = vpop.eup %1273 }
 0x3e3   :  { %v326_v36 = vadd.f32 1.0, %v1274_v35 }
 0x3e5   :  { %1275 = vrcp.f32 %v326_v36 }
 0x3ef   :  { %v1276_v37 = vpop.eup %1275 }
 0x3f0   :  { %v333_v41 = vmul.f32 %v1276_v37, %v331_v40 }
 0x453   :  { %v336_v38 = vpop.permute.xlu0 %335 }
 0x454   :  { %v338_v39 = vmul.f32 %v1276_v37, %v336_v38 }
 0x456   :  { %340 = vrot.lane.b32.xlu1 %v338_v39, %s1406_s29 }
 0x4c8   :  { %v341_v42 = vpop.permute.xlu1 %340 }
 0x4c9   :  { %v343_v43 = vadd.f32 %v341_v42, %v333_v41 }
 0x4cb   :  { %1277 = vtanh.f32 %v343_v43  ;;  %v443_v60 = vrot.slane %v343_v43, 7 }
 0x4d5   :  { %v1278_v44 = vpop.eup %1277 }
 0x4d6   :  { %346 = vrot.lane.b32.xlu0 %v1278_v44, %s1405_s2 }
 0x548   :  { %v347_v45 = vpop.permute.xlu0 %346 }
 0x549   :  { %v1519_v46 = vmul.f32 %v1276_v37, %v347_v45 }
 0x54b   :  { %v356_v47 = vrot.slane %v1519_v46, 1 }
 0x54d   :  { %357 = vrot.lane.b32.xlu1 %v356_v47, %s1406_s29 }
 0x5bf   :  { %v358_v48 = vpop.permute.xlu1 %357 }
 0x5c0   :  { %1148 = vmatmul.mubr.msk.f32.vlgmr.msra.gmra.mrb[2].mxu1 %vm142_vm4, %v358_v48 }
 0x5c1   :  { %1231 = vmatpush3.bf16.msra.mxu1 %v1479_v5  ;;  %1169 = vmatprep.mubr.msk.f32.mxu1 %vm1404_vm0, %v1403_v1 }
 0x5c2   :  { %1232 = vmatprep.subr.bf16.mxu1 %v1402_v0 }
 0x5c5   :  { %1234 = vmatpush3.bf16.msra.mxu1 %v1482_v9 }
 0x5c6   :  { %1241 = vmatprep.subr.bf16.mxu1 %v1402_v0 }
 0x693   :  { %v427_v49 = vpop.f32.mrb[2].mxu1 }
 0x694   :  { %v432_v50 = vrot.slane %v427_v49, 6  ;;  %v1149_v51 = vpop.f32.mrb[3].mxu1 }
 0x696   :  { %v434_v52 = vadd.f32 %v432_v50, %v1501_v10 }
 0x698   :  { %1279 = vtanh.f32 %v434_v52  ;;  %v1058_v54 = vmul.f32 -1.442695, %v434_v52 }
 0x69a   :  { %1281 = vpow2.f32 %v1058_v54 }
 0x6a2   :  { %v1280_v53 = vpop.eup %1279 }
 0x6a3   :  { %447 = vrot.lane.b32.xlu0 %v1280_v53, %s1405_s2 }
 0x6a4   :  { %v1282_v55 = vpop.eup %1281 }
 0x6a5   :  { %v438_v56 = vadd.f32 1.0, %v1282_v55 }
 0x6a7   :  { %1283 = vrcp.f32 %v438_v56 }
 0x6b1   :  { %v1284_v57 = vpop.eup %1283 }
 0x6b2   :  { %v445_v61 = vmul.f32 %v1284_v57, %v443_v60 }
 0x715   :  { %v448_v58 = vpop.permute.xlu0 %447 }
 0x716   :  { %v450_v59 = vmul.f32 %v1284_v57, %v448_v58 }
 0x718   :  { %452 = vrot.lane.b32.xlu1 %v450_v59, %s1406_s29 }
 0x78a   :  { %v453_v62 = vpop.permute.xlu1 %452 }
 0x78b   :  { %v455_v63 = vadd.f32 %v453_v62, %v445_v61 }
 0x78d   :  { %1285 = vtanh.f32 %v455_v63  ;;  %v555_v21 = vrot.slane %v455_v63, 7 }
 0x797   :  { %v1286_v2 = vpop.eup %1285 }
 0x798   :  { %458 = vrot.lane.b32.xlu0 %v1286_v2, %s1405_s2 }
 0x80a   :  { %v459_v3 = vpop.permute.xlu0 %458 }
 0x80b   :  { %v1534_v4 = vmul.f32 %v1284_v57, %v459_v3 }
 0x80d   :  { %v468_v6 = vrot.slane %v1534_v4, 2 }
 0x80f   :  { %469 = vrot.lane.b32.xlu1 %v468_v6, %s1406_s29 }
 0x881   :  { %v470_v7 = vpop.permute.xlu1 %469 }
 0x882   :  { %1159 = vmatmul.mubr.msk.f32.vlgmr.msra.gmra.mrb[4].mxu0 %vm142_vm4, %v470_v7 }
 0x883   :  { %1237 = vmatpush3.bf16.msra.mxu0 %v1479_v5  ;;  %1180 = vmatprep.mubr.msk.f32.mxu0 %vm1404_vm0, %v1403_v1 }
 0x884   :  { %1238 = vmatprep.subr.bf16.mxu0 %v1402_v0 }
 0x887   :  { %1240 = vmatpush3.bf16.msra.mxu0 %v1482_v9 }
 0x888   :  { %1247 = vmatprep.subr.bf16.mxu0 %v1402_v0 }
 0x955   :  { %v539_v8 = vpop.f32.mrb[4].mxu0 }
 0x956   :  { %v544_v11 = vrot.slane %v539_v8, 5  ;;  %v1160_v12 = vpop.f32.mrb[5].mxu0 }
 0x958   :  { %v546_v13 = vadd.f32 %v544_v11, %v1501_v10 }
 0x95a   :  { %1287 = vtanh.f32 %v546_v13  ;;  %v1060_v15 = vmul.f32 -1.442695, %v546_v13 }
 0x95c   :  { %1289 = vpow2.f32 %v1060_v15 }
 0x964   :  { %v1288_v14 = vpop.eup %1287 }
 0x965   :  { %559 = vrot.lane.b32.xlu0 %v1288_v14, %s1405_s2 }
 0x966   :  { %v1290_v16 = vpop.eup %1289 }
 0x967   :  { %v550_v17 = vadd.f32 1.0, %v1290_v16 }
 0x969   :  { %1291 = vrcp.f32 %v550_v17 }
 0x973   :  { %v1292_v18 = vpop.eup %1291 }
 0x974   :  { %v557_v22 = vmul.f32 %v1292_v18, %v555_v21 }
 0x9d7   :  { %v560_v19 = vpop.permute.xlu0 %559 }
 0x9d8   :  { %v562_v20 = vmul.f32 %v1292_v18, %v560_v19 }
 0x9da   :  { %564 = vrot.lane.b32.xlu1 %v562_v20, %s1406_s29 }
 0xa4c   :  { %v565_v23 = vpop.permute.xlu1 %564 }
 0xa4d   :  { %v567_v24 = vadd.f32 %v565_v23, %v557_v22 }
 0xa4f   :  { %1293 = vtanh.f32 %v567_v24  ;;  %v667_v41 = vrot.slane %v567_v24, 7 }
 0xa59   :  { %v1294_v25 = vpop.eup %1293 }
 0xa5a   :  { %570 = vrot.lane.b32.xlu0 %v1294_v25, %s1405_s2 }
 0xacc   :  { %v571_v26 = vpop.permute.xlu0 %570 }
 0xacd   :  { %v1549_v27 = vmul.f32 %v1292_v18, %v571_v26 }
 0xacf   :  { %v580_v28 = vrot.slane %v1549_v27, 3 }
 0xad1   :  { %581 = vrot.lane.b32.xlu1 %v580_v28, %s1406_s29 }
 0xb43   :  { %v582_v29 = vpop.permute.xlu1 %581 }
 0xb44   :  { %1170 = vmatmul.mubr.msk.f32.vlgmr.msra.gmra.mrb[4].mxu1 %vm142_vm4, %v582_v29 }
 0xb45   :  { %1243 = vmatpush3.bf16.msra.mxu1 %v1479_v5  ;;  %1191 = vmatprep.mubr.msk.f32.mxu1 %vm1404_vm0, %v1403_v1 }
 0xb46   :  { %1244 = vmatprep.subr.bf16.mxu1 %v1402_v0 }
 0xb49   :  { %1246 = vmatpush3.bf16.msra.mxu1 %v1482_v9 }
 0xc17   :  { %v651_v30 = vpop.f32.mrb[4].mxu1 }
 0xc18   :  { %v656_v31 = vrot.slane %v651_v30, 4  ;;  %v1171_v32 = vpop.f32.mrb[5].mxu1 }
 0xc1a   :  { %v658_v33 = vadd.f32 %v656_v31, %v1501_v10 }
 0xc1c   :  { %1295 = vtanh.f32 %v658_v33  ;;  %v1062_v35 = vmul.f32 -1.442695, %v658_v33 }
 0xc1e   :  { %1297 = vpow2.f32 %v1062_v35 }
 0xc26   :  { %v1296_v34 = vpop.eup %1295 }
 0xc27   :  { %671 = vrot.lane.b32.xlu0 %v1296_v34, %s1405_s2 }
 0xc28   :  { %v1298_v36 = vpop.eup %1297 }
 0xc29   :  { %v662_v37 = vadd.f32 1.0, %v1298_v36 }
 0xc2b   :  { %1299 = vrcp.f32 %v662_v37 }
 0xc35   :  { %v1300_v38 = vpop.eup %1299 }
 0xc36   :  { %v669_v42 = vmul.f32 %v1300_v38, %v667_v41 }
 0xc99   :  { %v672_v39 = vpop.permute.xlu0 %671 }
 0xc9a   :  { %v674_v40 = vmul.f32 %v1300_v38, %v672_v39 }
 0xc9c   :  { %676 = vrot.lane.b32.xlu1 %v674_v40, %s1406_s29 }
 0xd0e   :  { %v677_v43 = vpop.permute.xlu1 %676 }
 0xd0f   :  { %v679_v44 = vadd.f32 %v677_v43, %v669_v42 }
 0xd11   :  { %1301 = vtanh.f32 %v679_v44 }
 0xd1b   :  { %v1302_v45 = vpop.eup %1301 }
 0xd1c   :  { %682 = vrot.lane.b32.xlu0 %v1302_v45, %s1405_s2 }
 0xd8e   :  { %v683_v47 = vpop.permute.xlu0 %682 }
 0xd8f   :  { %v1563_v48 = vmul.f32 %v1300_v38, %v683_v47 }
 0xd91   :  { %v692_v49 = vrot.slane %v1563_v48, 4 }
 0xd93   :  { %693 = vrot.lane.b32.xlu1 %v692_v49, %s1406_s29 }
 0xe05   :  { %v694_v50 = vpop.permute.xlu1 %693 }
 0xe06   :  { %1181 = vmatmul.mubr.msk.f32.vlgmr.msra.gmra.mrb[6].mxu0 %vm142_vm4, %v694_v50 }
 0xe07   :  { %1249 = vmatpush3.bf16.msra.mxu0 %v1479_v5  ;;  %1202 = vmatprep.mubr.msk.f32.mxu0 %vm1404_vm0, %v1403_v1 }
 0xe08   :  { %1250 = vmatprep.subr.bf16.mxu0 %v1402_v0  ;;  %v779_v0 = vrot.slane %v679_v44, 7 }
 0xe0b   :  { %1252 = vmatpush3.bf16.msra.mxu0 %v1482_v9 }
 0xed9   :  { %v763_v51 = vpop.f32.mrb[6].mxu0 }
 0xeda   :  { %v768_v52 = vrot.slane %v763_v51, 3  ;;  %v1182_v53 = vpop.f32.mrb[7].mxu0 }
 0xedc   :  { %v770_v54 = vadd.f32 %v768_v52, %v1501_v10 }
 0xede   :  { %1303 = vtanh.f32 %v770_v54  ;;  %v1064_v56 = vmul.f32 -1.442695, %v770_v54 }
 0xee0   :  { %1305 = vpow2.f32 %v1064_v56  ;;  %v1041_v56 = vstv %s1614_s4 }
 0xee8   :  { %v1304_v55 = vpop.eup %1303 }
 0xee9   :  { %783 = vrot.lane.b32.xlu0 %v1304_v55, %s1405_s2 }
 0xeea   :  { %v1306_v57 = vpop.eup %1305 }
 0xeeb   :  { %v774_v5 = vadd.f32 1.0, %v1306_v57 }
 0xeed   :  { %1307 = vrcp.f32 %v774_v5 }
 0xef7   :  { %v1308_v58 = vpop.eup %1307 }
 0xef8   :  { %v781_v9 = vmul.f32 %v1308_v58, %v779_v0 }
 0xf5b   :  { %v784_v1 = vpop.permute.xlu0 %783 }
 0xf5c   :  { %v786_v59 = vmul.f32 %v1308_v58, %v784_v1 }
 0xf5e   :  { %788 = vrot.lane.b32.xlu1 %v786_v59, %s1406_s29 }
 0xfd0   :  { %v789_v60 = vpop.permute.xlu1 %788 }
 0xfd1   :  { %v791_v61 = vadd.f32 %v789_v60, %v781_v9 }
 0xfd3   :  { %1309 = vtanh.f32 %v791_v61  ;;  %v891_v20 = vrot.slane %v791_v61, 7 }
 0xfdd   :  { %v1310_v62 = vpop.eup %1309 }
 0xfde   :  { %794 = vrot.lane.b32.xlu0 %v1310_v62, %s1405_s2 }
0x1050   :  { %v795_v63 = vpop.permute.xlu0 %794 }
0x1051   :  { %v797_v2 = vmul.f32 %v1308_v58, %v795_v63 }
0x1053   :  { %v804_v3 = vrot.slane %v797_v2, 5 }
0x1055   :  { %805 = vrot.lane.b32.xlu1 %v804_v3, %s1406_s29 }
0x10c7   :  { %v806_v6 = vpop.permute.xlu1 %805 }
0x10c8   :  { %1192 = vmatmul.mubr.msk.f32.vlgmr.msra.gmra.mrb[6].mxu1 %vm142_vm4, %v806_v6 }
0x119b   :  { %v875_v7 = vpop.f32.mrb[6].mxu1 }
0x119c   :  { %v880_v8 = vrot.slane %v875_v7, 2  ;;  %v1193_v11 = vpop.f32.mrb[7].mxu1 }
0x119e   :  { %v882_v12 = vadd.f32 %v880_v8, %v1501_v10 }
0x11a0   :  { %1311 = vtanh.f32 %v882_v12  ;;  %v1066_v14 = vmul.f32 -1.442695, %v882_v12 }
0x11a2   :  { %1313 = vpow2.f32 %v1066_v14 }
0x11aa   :  { %v1312_v13 = vpop.eup %1311 }
0x11ab   :  { %895 = vrot.lane.b32.xlu0 %v1312_v13, %s1405_s2 }
0x11ac   :  { %v1314_v15 = vpop.eup %1313 }
0x11ad   :  { %v886_v16 = vadd.f32 1.0, %v1314_v15 }
0x11af   :  { %1315 = vrcp.f32 %v886_v16 }
0x11b9   :  { %v1316_v17 = vpop.eup %1315 }
0x11ba   :  { %v893_v21 = vmul.f32 %v1316_v17, %v891_v20 }
0x121d   :  { %v896_v18 = vpop.permute.xlu0 %895 }
0x121e   :  { %v898_v19 = vmul.f32 %v1316_v17, %v896_v18 }
0x1220   :  { %900 = vrot.lane.b32.xlu1 %v898_v19, %s1406_s29 }
0x1292   :  { %v901_v22 = vpop.permute.xlu1 %900 }
0x1293   :  { %v903_v23 = vadd.f32 %v901_v22, %v893_v21 }
0x1295   :  { %1317 = vtanh.f32 %v903_v23 }
0x129f   :  { %v1318_v24 = vpop.eup %1317 }
0x12a0   :  { %906 = vrot.lane.b32.xlu0 %v1318_v24, %s1405_s2 }
0x1312   :  { %v907_v25 = vpop.permute.xlu0 %906 }
0x1313   :  { %v909_v26 = vmul.f32 %v1316_v17, %v907_v25 }
0x1315   :  { %v916_v28 = vrot.slane %v909_v26, 6 }
0x1317   :  { %917 = vrot.lane.b32.xlu1 %v916_v28, %s1406_s29 }
0x1389   :  { %v918_v29 = vpop.permute.xlu1 %917 }
0x138a   :  { %1203 = vmatmul.mubr.msk.f32.vlgmr.msra.gmra.mrb[8].mxu0 %vm142_vm4, %v918_v29 }
0x145d   :  { %v987_v30 = vpop.f32.mrb[8].mxu0 }
0x145e   :  { %v992_v31 = vrot.slane %v987_v30, 1  ;;  %v1204_v32 = vpop.f32.mrb[9].mxu0 }
0x1460   :  { %v994_v33 = vadd.f32 %v992_v31, %v1501_v10  ;;  %v1003_v10 = vrot.slane %v903_v23, 7 }
0x1462   :  { %1319 = vtanh.f32 %v994_v33  ;;  %v1068_v35 = vmul.f32 -1.442695, %v994_v33 }
0x1464   :  { %1321 = vpow2.f32 %v1068_v35 }
0x146c   :  { %v1320_v34 = vpop.eup %1319 }
0x146d   :  { %1007 = vrot.lane.b32.xlu0 %v1320_v34, %s1405_s2 }
0x146e   :  { %v1322_v36 = vpop.eup %1321 }
0x146f   :  { %v998_v37 = vadd.f32 1.0, %v1322_v36 }
0x1471   :  { %1323 = vrcp.f32 %v998_v37 }
0x147b   :  { %v1324_v38 = vpop.eup %1323 }
0x147c   :  { %v1005_v41 = vmul.f32 %v1324_v38, %v1003_v10 }
0x14df   :  { %v1008_v39 = vpop.permute.xlu0 %1007 }
0x14e0   :  { %v1010_v40 = vmul.f32 %v1324_v38, %v1008_v39 }
0x14e2   :  { %1012 = vrot.lane.b32.xlu1 %v1010_v40, %s1406_s29 }
0x14e6   :  { %351 = vrot.lane.b32.xlu1 %v1519_v46, %s1406_s29 }
0x14ea   :  { %575 = vrot.lane.b32.xlu1 %v1549_v27, %s1406_s29 }
0x14ee   :  { %799 = vrot.lane.b32.xlu1 %v797_v2, %s1406_s29 }
0x1554   :  { %v1013_v42 = vpop.permute.xlu1 %1012 }
0x1555   :  { %v1015_v43 = vadd.f32 %v1013_v42, %v1005_v41 }
0x1557   :  { %1325 = vtanh.f32 %v1015_v43 }
0x1558   :  { %v352_v44 = vpop.permute.xlu1 %351 }
0x1559   :  { %355 = vst.msk [vmem:[#allocation2] sm:$0x2] %vm354_vm5, %v352_v44 }
0x155c   :  { %v576_v45 = vpop.permute.xlu1 %575 }
0x155d   :  { %579 = vst.msk [vmem:[#allocation2] sm:$0x8] %vm578_vm6, %v576_v45 }
0x1560   :  { %v800_v47 = vpop.permute.xlu1 %799 }
0x1561   :  { %v1326_v49 = vpop.eup %1325  ;;  %803 = vst.msk [vmem:[#allocation2] sm:$0x20] %vm802_vm7, %v800_v47 }
0x1562   :  { %1018 = vrot.lane.b32.xlu0 %v1326_v49, %s1405_s2 }
0x1566   :  { %463 = vrot.lane.b32.xlu0 %v1534_v4, %s1406_s29 }
0x156a   :  { %687 = vrot.lane.b32.xlu0 %v1563_v48, %s1406_s29  ;;  %v1069_v48 = vld [vmem:[%s1613_s3] ss:$0 sm:$0xff] }
0x156e   :  { %911 = vrot.lane.b32.xlu0 %v909_v26, %s1406_s29 }
0x15d4   :  { %v1019_v46 = vpop.permute.xlu0 %1018 }
0x15d5   :  { %v1021_v27 = vmul.f32 %v1324_v38, %v1019_v46 }
0x15d7   :  { %1023 = vrot.lane.b32.xlu1 %v1021_v27, %s1406_s29 }
0x15d8   :  { %v464_v50 = vpop.permute.xlu0 %463 }
0x15d9   :  { %467 = vst.msk [vmem:[#allocation2] sm:$0x4] %vm466_vm8, %v464_v50 }
0x15dc   :  { %v688_v51 = vpop.permute.xlu0 %687 }
0x15dd   :  { %691 = vst.msk [vmem:[#allocation2] sm:$0x10] %vm690_vm9, %v688_v51 }
0x15e0   :  { %v912_v52 = vpop.permute.xlu0 %911 }
0x15e1   :  { %915 = vst.msk [vmem:[#allocation2] sm:$0x40] %vm914_vm10, %v912_v52 }
0x1649   :  { %v1024_v4 = vpop.permute.xlu1 %1023 }
0x164a   :  { %1027 = vst.msk [vmem:[#allocation2] sm:$0x80] %vm1026_vm11, %v1024_v4 }
0x1651   :  { %v1028_v53 = vld [vmem:[#allocation2] sm:$0xff] }
0x1652   :  { %v1036_v54 = vmul.f32 %v1069_v48, %v1028_v53 }
0x1654   :  { %v1037_v55 = vsel %vm142_vm4, %v1036_v54, 0.0 }
0x1655   :  { %1038 = vadd.xlane.f32.xlu0 %v1037_v55 }
0x16e2   :  { %v1039_v57 = vpop.xlane.xlu0 %1038 }
0x16e3   :  { %v1042_v5 = vadd.f32 %v1041_v56, %v1039_v57 }
0x16e5   :  { %v1043_v58 = vmax.f32 %v1042_v5, 0.0 }
0x16e7   :  { %1045 = vst.msk [vmem:[%s1615_s5] sm:$0xff] %vm1044_vm12, %v1043_v58 }
0x16e8   :  { %1050 = vsyncpa [#allocation5], 1 }
0x16e9   :  { %1051 = vsyncpa [#allocation7], 1 }

</bundles_post_ra>
